<compile_context>
chip_gen: v6e
topology: v6e:2x2x1
jax: 0.10.0
libtpu: 0.0.40
codegen_flags: <defaults>
</compile_context>

<pallas_src>
import math

import numpy as np
import jax
import jax.numpy as jnp
from jax.experimental import pallas as pl
from jax.experimental.pallas import tpu as pltpu


_VMEM_LIMIT = 32 * 1024 * 1024       # safe scoped-VMEM request on v5e/v6e/v7x
_BLOCK_BUDGET = 16 * 1024 * 1024     # budget for double-buffered in+out blocks
_KRON_MAX_BYTES = 2 * 1024 * 1024    # max f32 size of the fused Kronecker matrix


def _round_up(a: int, b: int) -> int:
    return ((a + b - 1) // b) * b


def _out_size(in_size: int, factor: float) -> int:
    # Same double-precision floor(input_size * scale_factor) PyTorch uses.
    return int(math.floor(in_size * factor))


def _interp_matrix(out_size: int, in_size: int) -> np.ndarray:
    """Row-stochastic (out_size, in_size) matrix for 1-D linear interpolation,
    align_corners=True (PyTorch convention). Built on host in float64."""
    if out_size == 1:
        src = np.zeros((1,), np.float64)
    else:
        src = np.arange(out_size, dtype=np.float64) * ((in_size - 1) / (out_size - 1))
    i0 = np.clip(np.floor(src).astype(np.int64), 0, in_size - 1)
    i1 = np.minimum(i0 + 1, in_size - 1)
    w1 = src - i0
    w0 = 1.0 - w1
    m = np.zeros((out_size, in_size), np.float64)
    rows = np.arange(out_size)
    m[rows, i0] += w0
    m[rows, i1] += w1
    return m


# ---------------------------------------------------------------------------
# Kernels
# ---------------------------------------------------------------------------

def _kron_kernel(x_ref, kt_ref, o_ref):
    # x_ref: (bm, HW_in), kt_ref: (HW_in, HW_out) with factor folded in.
    o_ref[...] = jnp.dot(
        x_ref[...], kt_ref[...], preferred_element_type=jnp.float32
    ).astype(o_ref.dtype)


def _sep_kernel(ah_ref, awt_ref, x_ref, o_ref):
    # ah_ref: (H_out, H_in) f32 (factor folded in), awt_ref: (W_in, W_out),
    # x_ref: (B, H_in, W_in), o_ref: (B, H_out, W_out).
    b, h_in, w_in = x_ref.shape
    h_out = ah_ref.shape[0]
    w_out = awt_ref.shape[1]

    x = x_ref[...]
    # W-contraction as one big matmul: merge leading dims (layout-free reshape).
    xw = jnp.dot(x.reshape(b * h_in, w_in), awt_ref[...],
                 preferred_element_type=jnp.float32)
    xw = xw.reshape(b, h_in, w_out)

    # H-contraction keeping B as a batch dim (standard batched MXU matmul).
    ahb = jnp.broadcast_to(ah_ref[...], (b, h_out, h_in))
    out = jnp.einsum("boh,bhw->bow", ahb, xw,
                     preferred_element_type=jnp.float32)
    # NOTE: if W_out < 128 (large-field downsample) this store is lane-sparse;
    # packing several slabs along the lane axis would make it lane-dense.
    o_ref[...] = out.astype(o_ref.dtype)


# ---------------------------------------------------------------------------
# Wrappers
# ---------------------------------------------------------------------------

def _resize_kron(x_flat, kt, h_out, w_out):
    nc, h_in, w_in = x_flat.shape
    hw_in = h_in * w_in
    hw_out = h_out * w_out
    x2d = x_flat.reshape(nc, hw_in)

    nc8 = _round_up(nc, 8)
    bm = min(256, nc8)
    if nc8 >= 16:
        # Keep >= 2 parallel grid steps so v7x can shard across both TCs.
        bm = min(bm, _round_up(nc8 // 2, 8))
    nc_pad = _round_up(nc, bm)
    if nc_pad != nc:
        x2d = jnp.pad(x2d, ((0, nc_pad - nc), (0, 0)))

    out2d = pl.pallas_call(
        _kron_kernel,
        out_shape=jax.ShapeDtypeStruct((nc_pad, hw_out), x_flat.dtype),
        grid_spec=pltpu.PrefetchScalarGridSpec(
            num_scalar_prefetch=0,
            grid=(nc_pad // bm,),
            in_specs=[
                pl.BlockSpec((bm, hw_in), lambda i: (i, 0)),
                pl.BlockSpec((hw_in, hw_out), lambda i: (0, 0)),
            ],
            out_specs=pl.BlockSpec((bm, hw_out), lambda i: (i, 0)),
        ),
        compiler_params=pltpu.CompilerParams(
            dimension_semantics=("parallel",),
            vmem_limit_bytes=_VMEM_LIMIT,
        ),
    )(x2d, kt)
    return out2d[:nc].reshape(nc, h_out, w_out)


def _pick_batch(nc, h_in, w_in, h_out, w_out, itemsize):
    per_slab = (h_in * w_in + h_out * w_out) * itemsize
    b_vmem = max(1, _BLOCK_BUDGET // (2 * per_slab))   # 2x: double-buffered blocks
    b = int(min(b_vmem, nc))
    if nc >= 2:
        b = min(b, -(-nc // 2))   # keep >= 2 grid steps (v7x dual TensorCore)
    return max(1, b)


def _resize_separable(x_flat, ah, awt, h_out, w_out):
    nc, h_in, w_in = x_flat.shape
    bsz = _pick_batch(nc, h_in, w_in, h_out, w_out, x_flat.dtype.itemsize)
    nc_pad = _round_up(nc, bsz)
    if nc_pad != nc:
        x_flat = jnp.pad(x_flat, ((0, nc_pad - nc), (0, 0), (0, 0)))

    out = pl.pallas_call(
        _sep_kernel,
        out_shape=jax.ShapeDtypeStruct((nc_pad, h_out, w_out), x_flat.dtype),
        grid_spec=pltpu.PrefetchScalarGridSpec(
            num_scalar_prefetch=0,
            grid=(nc_pad // bsz,),
            in_specs=[
                pl.BlockSpec((h_out, h_in), lambda i: (0, 0)),
                pl.BlockSpec((w_in, w_out), lambda i: (0, 0)),
                pl.BlockSpec((bsz, h_in, w_in), lambda i: (i, 0, 0)),
            ],
            out_specs=pl.BlockSpec((bsz, h_out, w_out), lambda i: (i, 0, 0)),
        ),
        compiler_params=pltpu.CompilerParams(
            dimension_semantics=("parallel",),
            vmem_limit_bytes=_VMEM_LIMIT,
        ),
    )(ah, awt, x_flat)
    return out[:nc]


def resize_transform(x: jnp.ndarray, vel_resize: float) -> jnp.ndarray:
    """Pallas forward pass of voxelmorph ResizeTransform for ndims=2 (NCHW)."""
    # TODO(synk): ndims=1 ('linear') and ndims=3 ('trilinear') modes not implemented.
    factor = 1.0 / vel_resize
    if factor == 1.0:
        return x

    n, c, h_in, w_in = x.shape
    h_out = _out_size(h_in, factor)
    w_out = _out_size(w_in, factor)

    # Fold `factor` into the H interpolation matrix (bilinear is linear, so
    # factor*interp(x) == interp(factor*x)).
    ah = factor * _interp_matrix(h_out, h_in)        # (H_out, H_in), float64
    aw = _interp_matrix(w_out, w_in)                 # (W_out, W_in), float64

    mat_dtype = jnp.bfloat16 if x.dtype == jnp.bfloat16 else jnp.float32
    x_flat = x.reshape(n * c, h_in, w_in)

    hw_in, hw_out = h_in * w_in, h_out * w_out
    if hw_in * hw_out * 4 <= _KRON_MAX_BYTES:
        # Small fields: single lane-dense fused Kronecker matmul.
        kt = jnp.asarray(np.kron(ah, aw).T, dtype=mat_dtype)    # (HW_in, HW_out)
        out_flat = _resize_kron(x_flat, kt, h_out, w_out)
    else:
        ah_j = jnp.asarray(ah, dtype=jnp.float32)
        awt_j = jnp.asarray(aw.T, dtype=mat_dtype)               # (W_in, W_out)
        out_flat = _resize_separable(x_flat, ah_j, awt_j, h_out, w_out)

    return out_flat.reshape(n, c, h_out, w_out)


def _reference(x, vel_resize):
    """Plain-JAX reference (same math, no Pallas) for validation."""
    factor = 1.0 / vel_resize
    if factor == 1.0:
        return x
    _, _, h_in, w_in = x.shape
    h_out = _out_size(h_in, factor)
    w_out = _out_size(w_in, factor)
    ah = jnp.asarray(_interp_matrix(h_out, h_in), jnp.float32)
    aw = jnp.asarray(_interp_matrix(w_out, w_in), jnp.float32)
    return factor * jnp.einsum("oh,nchw,pw->ncop", ah, x.astype(jnp.float32), aw)


if __name__ == "__main__":
    key = jax.random.PRNGKey(0)
    # Vector field for a 2-D transform: N=2, C=2 (flow components), 16x16.
    x = jax.random.normal(key, (2, 2, 16, 16), dtype=jnp.float32)

    # vel_resize = 2.0 -> factor = 0.5 < 1 (downsample, then scale). Kronecker path.
    y = jax.block_until_ready(resize_transform(x, vel_resize=2.0))
    assert y.shape == (2, 2, 8, 8), y.shape
    y_ref = _reference(x, 2.0)
    assert jnp.allclose(y, y_ref, atol=5e-2, rtol=5e-2)

    # vel_resize = 0.5 -> factor = 2.0 > 1 (scale, then upsample). Kronecker path.
    z = jax.block_until_ready(resize_transform(x, vel_resize=0.5))
    assert z.shape == (2, 2, 32, 32), z.shape
    z_ref = _reference(x, 0.5)
    assert jnp.allclose(z, z_ref, atol=5e-2, rtol=5e-2)

    # Larger field exercises the batched separable path (2-step parallel grid).
    x2 = jax.random.normal(jax.random.PRNGKey(1), (2, 2, 40, 96), dtype=jnp.float32)
    w = jax.block_until_ready(resize_transform(x2, vel_resize=0.5))
    assert w.shape == (2, 2, 80, 192), w.shape
    w_ref = _reference(x2, 0.5)
    assert jnp.allclose(w, w_ref, atol=5e-2, rtol=5e-2)

    print("KERNEL_OK")
</pallas_src>

<mosaic_0001>
module attributes {stable_mosaic.version = 11 : i64} {
  func.func @_kron_kernel(%arg0: i32, %arg1: memref<8x256xf32, #tpu.memory_space<vmem>>, %arg2: memref<256x64xf32, #tpu.memory_space<vmem>>, %arg3: memref<8x64xf32, #tpu.memory_space<vmem>>) attributes {dimension_semantics = [#tpu.dimension_semantics<parallel>], iteration_bounds = array<i64: 1>, scalar_prefetch = 0 : i64, scratch_operands = 0 : i64, tpu.core_type = #tpu.core_type<tc>, window_params = [{transform_indices = @transform_0, window_bounds = array<i64: 8, 256>}, {pipeline_mode = #tpu.pipeline_mode<synchronous>, transform_indices = @transform_1, window_bounds = array<i64: 256, 64>}, {transform_indices = @transform_2, window_bounds = array<i64: 8, 64>}]} {
    %c0 = arith.constant 0 : index
    %c0_0 = arith.constant 0 : index
    %0 = vector.load %arg1[%c0, %c0_0] : memref<8x256xf32, #tpu.memory_space<vmem>>, vector<8x256xf32>
    %c0_1 = arith.constant 0 : index
    %c0_2 = arith.constant 0 : index
    %1 = vector.load %arg2[%c0_1, %c0_2] : memref<256x64xf32, #tpu.memory_space<vmem>>, vector<256x64xf32>
    %cst = arith.constant dense<0.000000e+00> : vector<8x64xf32>
    %2 = tpu.matmul %0, %1, %cst {dimension_numbers = #tpu.dot_dimension_numbers<[1], [0], [0], [1], [0, 0, 1, 1], [], []>} : vector<8x256xf32>, vector<256x64xf32>, vector<8x64xf32> -> vector<8x64xf32>
    %c0_3 = arith.constant 0 : index
    %c0_4 = arith.constant 0 : index
    %3 = vector.load %arg3[%c0_3, %c0_4] : memref<8x64xf32, #tpu.memory_space<vmem>>, vector<8x64xf32>
    tpu.vector_store %arg3[%c0_3, %c0_4], %2 {strides = array<i32>} : memref<8x64xf32, #tpu.memory_space<vmem>>, vector<8x64xf32>,
    return
  }
  func.func @transform_0(%arg0: i32) -> (i32, i32) {
    %c0_i32 = arith.constant 0 : i32
    %c0_i32_0 = arith.constant 0 : i32
    return %arg0, %c0_i32 : i32, i32
  }
  func.func @transform_1(%arg0: i32) -> (i32, i32) {
    %c0_i32 = arith.constant 0 : i32
    %c0_i32_0 = arith.constant 0 : i32
    %c0_i32_1 = arith.constant 0 : i32
    return %c0_i32, %c0_i32_0 : i32, i32
  }
  func.func @transform_2(%arg0: i32) -> (i32, i32) {
    %c0_i32 = arith.constant 0 : i32
    %c0_i32_0 = arith.constant 0 : i32
    return %arg0, %c0_i32 : i32, i32
  }
}

</mosaic_0001>

<bundles_post_ra>
// kernel: tpu_custom_call.1
= control target key start
LH: loop header
LB: loop body
LE: loop exit
PB: predicated region body
PF: predicated region fallthrough
CT: control target
= control target key end

     0   :  { %s311_s0 = inlined_call_operand.vmem [shape: f32[8,256], index: 0, kind: input, shape index: {}]   ;;  %s312_s1 = inlined_call_operand.vmem [shape: f32[256,64], index: 1, kind: input, shape index: {}]   ;;  %s313_s2 = inlined_call_operand.hbm [shape: f32[8,64], index: 2, kind: output, shape index: {}]  }
   0x1   :  { %v45_v0 = vld [vmem:[%s312_s1 + $0xf8] sm:$0xff]  ;;  %v44_v2 = vld [vmem:[%s312_s1 + $0xf0] sm:$0xff]  ;;  %v43_v4 = vld [vmem:[%s312_s1 + $0xe8] sm:$0xff] }
   0x2   :  { %v29_v1 = vld [vmem:[%s312_s1 + $0x78] sm:$0xff]  ;;  %132 = vmatprep.subr.mxu0 %v45_v0  ;;  %v28_v3 = vld [vmem:[%s312_s1 + $0x70] sm:$0xff]  ;;  %v27_v5 = vld [vmem:[%s312_s1 + $0x68] sm:$0xff] }
   0x3   :  { %133 = vmatpush3.msra.mxu0 %v29_v1  ;;  %v42_v6 = vld [vmem:[%s312_s1 + $0xe0] sm:$0xff]  ;;  %v41_v8 = vld [vmem:[%s312_s1 + $0xd8] sm:$0xff]  ;;  %v40_v10 = vld [vmem:[%s312_s1 + $0xd0] sm:$0xff] }
   0x4   :  { %134 = vmatprep.subr.mxu0 %v44_v2  ;;  %v26_v7 = vld [vmem:[%s312_s1 + $0x60] sm:$0xff]  ;;  %v25_v9 = vld [vmem:[%s312_s1 + $0x58] sm:$0xff]  ;;  %v24_v11 = vld [vmem:[%s312_s1 + $0x50] sm:$0xff] }
   0x5   :  { %135 = vmatpush3.msra.mxu0 %v28_v3  ;;  %v39_v12 = vld [vmem:[%s312_s1 + $0xc8] sm:$0xff] }
   0x6   :  { %136 = vmatprep.subr.mxu0 %v43_v4  ;;  %v13_v13 = vld [vmem:[%s311_s0 + $0x8] sm:$0xff] }
   0x7   :  { %137 = vmatpush3.msra.mxu0 %v27_v5  ;;  %v23_v14 = vld [vmem:[%s312_s1 + $0x48] sm:$0xff]  ;;  %110 = vmatprep.mubr.f32.mxu0 %v13_v13 }
   0x8   :  { %138 = vmatprep.subr.mxu0 %v42_v6 }
   0x9   :  { %139 = vmatpush3.msra.mxu0 %v26_v7 }
   0xa   :  { %140 = vmatprep.subr.mxu0 %v41_v8 }
   0xb   :  { %141 = vmatpush3.msra.mxu0 %v25_v9 }
   0xc   :  { %142 = vmatprep.subr.mxu0 %v40_v10 }
   0xd   :  { %7 = vsyncpa [#allocation3], 0  ;;  %143 = vmatpush3.msra.mxu0 %v24_v11  ;;  %v38_v15 = vld [vmem:[%s312_s1 + $0xc0] sm:$0xff]  ;;  %v37_v17 = vld [vmem:[%s312_s1 + $0xb8] sm:$0xff]  ;;  %s190_s21 = smov [#allocation2]   ;;  %vm116_vm0 = vcmask 523264  }
   0xe   :  { %144 = vmatprep.subr.mxu0 %v39_v12  ;;  %v22_v16 = vld [vmem:[%s312_s1 + $0x40] sm:$0xff]  ;;  %v21_v18 = vld [vmem:[%s312_s1 + $0x38] sm:$0xff]  ;;  %v36_v19 = vld [vmem:[%s312_s1 + $0xb0] sm:$0xff]  ;;  %s124_s22 = sshll.u32 %s190_s21, 4  ;;  %s125_s22 = int_to_ptr.vmem [resolvable:$true] %s124_s22 }
   0xf   :  { %145 = vmatpush3.msra.mxu0 %v23_v14  ;;  %v20_v20 = vld [vmem:[%s312_s1 + $0x30] sm:$0xff]  ;;  %v35_v21 = vld [vmem:[%s312_s1 + $0xa8] sm:$0xff]  ;;  %v34_v23 = vld [vmem:[%s312_s1 + $0xa0] sm:$0xff]  ;;  %s168_s23 = scalar_lea.vmem %s125_s22, 128  ;;  %p173_p1 = scmp.lt.s32.totalorder %s125_s22, %s125_s22 }
  0x10   :  { %146 = vmatprep.subr.mxu0 %v38_v15  ;;  %v19_v22 = vld [vmem:[%s312_s1 + $0x28] sm:$0xff]  ;;  %v18_v24 = vld [vmem:[%s312_s1 + $0x20] sm:$0xff]  ;;  %v33_v25 = vld [vmem:[%s312_s1 + $0x98] sm:$0xff]  ;;  %p169_p0 = scmp.ne.s32.totalorder %s125_s22, %s168_s23  ;;  %p174_p2 = scmp.lt.s32.totalorder %s168_s23, %s168_s23 }
  0x11   :  { %147 = vmatpush3.msra.mxu0 %v22_v16  ;;  %v17_v26 = vld [vmem:[%s312_s1 + $0x18] sm:$0xff]  ;;  %v32_v27 = vld [vmem:[%s312_s1 + $0x90] sm:$0xff]  ;;  %v31_v29 = vld [vmem:[%s312_s1 + $0x88] sm:$0xff] }
  0x12   :  { %148 = vmatprep.subr.mxu0 %v37_v17  ;;  %v16_v28 = vld [vmem:[%s312_s1 + $0x10] sm:$0xff]  ;;  %v15_v30 = vld [vmem:[%s312_s1 + $0x8] sm:$0xff]  ;;  %v30_v31 = vld [vmem:[%s312_s1 + $0x80] sm:$0xff]  ;;  %p175_p3 = por %p174_p2, %p173_p1 }
  0x13   :  { %149 = vmatpush3.msra.mxu0 %v21_v18  ;;  %v14_v32 = vld [vmem:[%s312_s1] sm:$0xff] }
  0x14   :  { %150 = vmatprep.subr.mxu0 %v36_v19  ;;  %v12_v33 = vld [vmem:[%s311_s0] sm:$0xff]  ;;  %p176_p4 = pnand %p175_p3, %p169_p0 }
  0x15   :  { %151 = vmatpush3.msra.mxu0 %v20_v20 }
  0x16   :  { %152 = vmatprep.subr.mxu0 %v35_v21 }
  0x17   :  { %153 = vmatpush3.msra.mxu0 %v19_v22 }
  0x18   :  { %154 = vmatprep.subr.mxu0 %v34_v23 }
  0x19   :  { %155 = vmatpush3.msra.mxu0 %v18_v24 }
  0x1a   :  { %156 = vmatprep.subr.mxu0 %v33_v25 }
  0x1b   :  { %157 = vmatpush3.msra.mxu0 %v17_v26 }
  0x1c   :  { %158 = vmatprep.subr.mxu0 %v32_v27 }
  0x1d   :  { %159 = vmatpush3.msra.mxu0 %v16_v28 }
  0x1e   :  { %160 = vmatprep.subr.mxu0 %v31_v29 }
  0x1f   :  { %161 = vmatpush3.msra.mxu0 %v15_v30 }
  0x20   :  { %162 = vmatprep.subr.mxu0 %v30_v31 }
  0x21   :  { %163 = vmatpush3.msra.mxu0 %v14_v32 }
  0x22   :  { %111 = vmatmul.mubr.f32.vlgmr.msra.gmra.mxu0 %v12_v33 }
  0xe2   :  { %v164_v34 = vpop.f32.mrf.mxu0 }
  0xe4   :  { %v165_v35 = vpop.f32.mrf.mxu0 }
  0xe5   :  { %v166_v36 = vadd.f32 %v165_v35, %v164_v34 }
  0xe7   :  { %117 = vst.msk [vmem:[#allocation2] sm:$0xff] %vm116_vm0, %v166_v36 }
  0xe8   :  { %179 = shalt.err (!%p176_p4)
}
  0xe9   :  { %127 = dma.vmem_to_hbm [thread:$0]  %s125_s22, 128, %s313_s2, [#allocation3]  }
  0xea   :  { %188 = dma.done.wait [#allocation3], 128  }
  0xeb   :  { %189 = vsyncadd [#allocation3], 4294967168 }
  0xec   :  { %131 = vsyncpa [#allocation3], 1 }

</bundles_post_ra>
